<compile_context>
chip_gen: v7x
topology: tpu7x:2x2x1
jax: 0.10.0
libtpu: 0.0.40
codegen_flags: <defaults>
</compile_context>

<pallas_src>
import jax
import jax.numpy as jnp
from jax.experimental import pallas as pl
from jax.experimental.pallas import tpu as pltpu

HIDDEN_DIM = 8


def _application_kernel(arg_ref, fn_ref, out_ref):
    # arg_ref: (H, TB)   fn_ref: (H, H, TB)   out_ref: (H, TB)
    # out[h, b] = tanh( sum_k arg[k, b] * fn[k, h, b] )
    a = arg_ref[...].astype(jnp.float32)                       # (H, TB)
    acc = a[0:1, :] * fn_ref[0].astype(jnp.float32)            # (H, TB), VPU
    for k in range(1, HIDDEN_DIM):                              # unrolled, static H=8
        acc = acc + a[k:k + 1, :] * fn_ref[k].astype(jnp.float32)
    out_ref[...] = jnp.tanh(acc).astype(out_ref.dtype)          # tanh rides the EUP


def _num_tensorcores():
    try:
        return max(1, int(getattr(jax.devices()[0], "num_cores", 1) or 1))
    except Exception:
        return 1


def semantic_intension_application_lane_dense(arg_t, fn_t, *, block_b=16384):
    """Lane-dense hot path (no transposes, no pads).

    arg_t: (H, B)     argument extension, type <e,t>, batch on the lane axis
    fn_t : (H, H, B)  function extension, type <<e,t>,<e,t>>, batch on lanes
    returns (H, B)  = tanh( sum_k arg_t[k, :] * fn_t[k, :, :] )
    """
    H, B = arg_t.shape
    assert H == HIDDEN_DIM and fn_t.shape == (H, H, B)
    itemsize = jnp.dtype(arg_t.dtype).itemsize

    if B <= block_b:
        # Single full-extent block: block dims == array dims, zero padding,
        # one DMA per operand.  Best choice on single-TC v5e/v6e.
        tb = B
    else:
        nblocks = pl.cdiv(B, block_b)
        ntc = _num_tensorcores()
        if ntc > 1 and nblocks % ntc:
            nblocks += ntc - (nblocks % ntc)        # balanced shards across TCs
        tb = pl.cdiv(pl.cdiv(B, nblocks), 128) * 128  # 128-multiple, ragged tail OK
    grid = (pl.cdiv(B, tb),)

    return pl.pallas_call(
        _application_kernel,
        out_shape=jax.ShapeDtypeStruct((H, B), arg_t.dtype),
        grid=grid,
        in_specs=[
            pl.BlockSpec((H, tb), lambda i: (0, i)),
            pl.BlockSpec((H, H, tb), lambda i: (0, 0, i)),
        ],
        out_specs=pl.BlockSpec((H, tb), lambda i: (0, i)),
        compiler_params=pltpu.CompilerParams(
            dimension_semantics=("parallel",),
            vmem_limit_bytes=32 * 1024 * 1024,      # v5e default scoped is 16 MiB
        ),
        cost_estimate=pl.CostEstimate(
            flops=2 * B * H * H,
            transcendentals=B * H,
            bytes_accessed=(B * H * H + B * H) * itemsize + B * H * itemsize,
        ),
    )(arg_t, fn_t)


def semantic_intension_application(argument, function, *, block_b=16384,
                                   small_b_threshold=4096):
    """Torch-shape compatibility wrapper.
       argument: (B, H, 1) extension of type <e,t>
       function: (B, H, H) extension of type <<e,t>,<e,t>>
       returns : (B, H, 1) = tanh(view(arg) @ fn) viewed back to <e,t> dims."""
    B, H, _ = function.shape
    assert H == HIDDEN_DIM
    arg_2d = argument.reshape(B, H)   # lhs type '<e,t>' -> view with type-e dims

    # Small-batch fast path: fused XLA einsum+tanh beats kernel + layout plumbing.
    if B < small_b_threshold:
        ext = jnp.einsum('bk,bkh->bh', arg_2d, function)
        return jnp.tanh(ext).reshape(-1, H, 1)

    # Large-batch path.  NOTE: callers on the hot path should produce/consume the
    # lane-dense (H, B)/(H, H, B) layout directly via
    # semantic_intension_application_lane_dense; the transposes below only exist
    # to honor the torch-shaped interface.
    arg_t = jnp.transpose(arg_2d)                       # (H, B)
    fn_t = jnp.transpose(function, (1, 2, 0))           # (H, H, B)
    out_t = semantic_intension_application_lane_dense(arg_t, fn_t, block_b=block_b)
    return jnp.transpose(out_t).reshape(-1, H, 1)       # rhs '<e,t>' -> (B, H, 1)


if __name__ == "__main__":
    H = HIDDEN_DIM
    key = jax.random.PRNGKey(0)
    k_state, k_wf, k_wa = jax.random.split(key, 3)

    W_fn = 0.1 * jax.random.normal(k_wf, (H, H * H), dtype=jnp.float32)
    W_arg = 0.1 * jax.random.normal(k_wa, (H, H), dtype=jnp.float32)

    def reference(state):
        # Plain-JAX mirror of the torch forward (leaf extensions + application).
        B = state.shape[0]
        function = jnp.tanh(state @ W_fn).reshape(B, H, H)   # '<<e,t>,<e,t>>'
        argument = jnp.tanh(state @ W_arg).reshape(B, H, 1)  # '<e,t>'
        ext = jnp.matmul(argument.reshape(B, 1, H), function)
        return jnp.tanh(ext.reshape(B, H, 1))

    # ---- lane-dense hot path: leaf extensions produced directly in (H,B)/(H,H,B) ----
    B1 = 1500  # not a multiple of 128 -> exercises masked tail stores, no padding
    state1 = jax.random.normal(k_state, (B1, H), dtype=jnp.float32)
    fn_lane = jnp.tanh(W_fn.T @ state1.T).reshape(H, H, B1)   # transpose folded into producer
    arg_lane = jnp.tanh(W_arg.T @ state1.T)                   # (H, B)
    out_lane = jax.block_until_ready(
        semantic_intension_application_lane_dense(arg_lane, fn_lane))
    ref1 = reference(state1)
    assert out_lane.shape == (H, B1)
    assert jnp.allclose(jnp.transpose(out_lane).reshape(B1, H, 1), ref1, atol=1e-5), \
        "lane-dense single-block path mismatch vs reference"

    # multi-block path with a ragged last block (forced small block_b)
    out_multi = jax.block_until_ready(
        semantic_intension_application_lane_dense(arg_lane, fn_lane, block_b=512))
    assert jnp.allclose(jnp.transpose(out_multi).reshape(B1, H, 1), ref1, atol=1e-5), \
        "lane-dense multi-block path mismatch vs reference"

    # ---- torch-shape compatibility wrapper, tiny batch (module's typical B=2) ----
    B2 = 2
    state2 = jax.random.normal(k_state, (B2, H), dtype=jnp.float32)
    function2 = jnp.tanh(state2 @ W_fn).reshape(B2, H, H)
    argument2 = jnp.tanh(state2 @ W_arg).reshape(B2, H, 1)
    out2 = jax.block_until_ready(semantic_intension_application(argument2, function2))
    ref2 = reference(state2)
    assert out2.shape == (B2, H, 1)
    assert jnp.allclose(out2, ref2, atol=1e-6), "small-batch fast path mismatch vs reference"

    print("KERNEL_OK")
</pallas_src>

<mosaic_0001>
module attributes {stable_mosaic.version = 11 : i64} {
  func.func @_application_kernel(%arg0: i32, %arg1: memref<8x1500xf32, #tpu.memory_space<vmem>>, %arg2: memref<8x8x1500xf32, #tpu.memory_space<vmem>>, %arg3: memref<8x1500xf32, #tpu.memory_space<vmem>>) attributes {dimension_semantics = [#tpu.dimension_semantics<parallel>], iteration_bounds = array<i64: 1>, scalar_prefetch = 0 : i64, scratch_operands = 0 : i64, tpu.core_type = #tpu.core_type<tc>, window_params = [{transform_indices = @transform_0, window_bounds = array<i64: 8, 1500>}, {transform_indices = @transform_1, window_bounds = array<i64: 8, 8, 1500>}, {transform_indices = @transform_2, window_bounds = array<i64: 8, 1500>}]} {
    %c0 = arith.constant 0 : index
    %c0_0 = arith.constant 0 : index
    %0 = vector.load %arg1[%c0, %c0_0] : memref<8x1500xf32, #tpu.memory_space<vmem>>, vector<8x1500xf32>
    %1 = vector.extract_strided_slice %0 {offsets = [0, 0], sizes = [1, 1500], strides = [1, 1]} : vector<8x1500xf32> to vector<1x1500xf32>
    %c0_1 = arith.constant 0 : index
    %c0_2 = arith.constant 0 : index
    %c0_3 = arith.constant 0 : index
    %2 = vector.load %arg2[%c0_1, %c0_2, %c0_3] : memref<8x8x1500xf32, #tpu.memory_space<vmem>>, vector<1x8x1500xf32>
    %3 = vector.shape_cast %2 : vector<1x8x1500xf32> to vector<8x1500xf32>
    %4 = vector.broadcast %1 : vector<1x1500xf32> to vector<8x1500xf32>
    %5 = arith.mulf %4, %3 : vector<8x1500xf32>
    %6 = vector.extract_strided_slice %0 {offsets = [1, 0], sizes = [1, 1500], strides = [1, 1]} : vector<8x1500xf32> to vector<1x1500xf32>
    %c1 = arith.constant 1 : index
    %c0_4 = arith.constant 0 : index
    %c0_5 = arith.constant 0 : index
    %7 = vector.load %arg2[%c1, %c0_4, %c0_5] : memref<8x8x1500xf32, #tpu.memory_space<vmem>>, vector<1x8x1500xf32>
    %8 = vector.shape_cast %7 : vector<1x8x1500xf32> to vector<8x1500xf32>
    %9 = vector.broadcast %6 : vector<1x1500xf32> to vector<8x1500xf32>
    %10 = arith.mulf %9, %8 : vector<8x1500xf32>
    %11 = arith.addf %5, %10 : vector<8x1500xf32>
    %12 = vector.extract_strided_slice %0 {offsets = [2, 0], sizes = [1, 1500], strides = [1, 1]} : vector<8x1500xf32> to vector<1x1500xf32>
    %c2 = arith.constant 2 : index
    %c0_6 = arith.constant 0 : index
    %c0_7 = arith.constant 0 : index
    %13 = vector.load %arg2[%c2, %c0_6, %c0_7] : memref<8x8x1500xf32, #tpu.memory_space<vmem>>, vector<1x8x1500xf32>
    %14 = vector.shape_cast %13 : vector<1x8x1500xf32> to vector<8x1500xf32>
    %15 = vector.broadcast %12 : vector<1x1500xf32> to vector<8x1500xf32>
    %16 = arith.mulf %15, %14 : vector<8x1500xf32>
    %17 = arith.addf %11, %16 : vector<8x1500xf32>
    %18 = vector.extract_strided_slice %0 {offsets = [3, 0], sizes = [1, 1500], strides = [1, 1]} : vector<8x1500xf32> to vector<1x1500xf32>
    %c3 = arith.constant 3 : index
    %c0_8 = arith.constant 0 : index
    %c0_9 = arith.constant 0 : index
    %19 = vector.load %arg2[%c3, %c0_8, %c0_9] : memref<8x8x1500xf32, #tpu.memory_space<vmem>>, vector<1x8x1500xf32>
    %20 = vector.shape_cast %19 : vector<1x8x1500xf32> to vector<8x1500xf32>
    %21 = vector.broadcast %18 : vector<1x1500xf32> to vector<8x1500xf32>
    %22 = arith.mulf %21, %20 : vector<8x1500xf32>
    %23 = arith.addf %17, %22 : vector<8x1500xf32>
    %24 = vector.extract_strided_slice %0 {offsets = [4, 0], sizes = [1, 1500], strides = [1, 1]} : vector<8x1500xf32> to vector<1x1500xf32>
    %c4 = arith.constant 4 : index
    %c0_10 = arith.constant 0 : index
    %c0_11 = arith.constant 0 : index
    %25 = vector.load %arg2[%c4, %c0_10, %c0_11] : memref<8x8x1500xf32, #tpu.memory_space<vmem>>, vector<1x8x1500xf32>
    %26 = vector.shape_cast %25 : vector<1x8x1500xf32> to vector<8x1500xf32>
    %27 = vector.broadcast %24 : vector<1x1500xf32> to vector<8x1500xf32>
    %28 = arith.mulf %27, %26 : vector<8x1500xf32>
    %29 = arith.addf %23, %28 : vector<8x1500xf32>
    %30 = vector.extract_strided_slice %0 {offsets = [5, 0], sizes = [1, 1500], strides = [1, 1]} : vector<8x1500xf32> to vector<1x1500xf32>
    %c5 = arith.constant 5 : index
    %c0_12 = arith.constant 0 : index
    %c0_13 = arith.constant 0 : index
    %31 = vector.load %arg2[%c5, %c0_12, %c0_13] : memref<8x8x1500xf32, #tpu.memory_space<vmem>>, vector<1x8x1500xf32>
    %32 = vector.shape_cast %31 : vector<1x8x1500xf32> to vector<8x1500xf32>
    %33 = vector.broadcast %30 : vector<1x1500xf32> to vector<8x1500xf32>
    %34 = arith.mulf %33, %32 : vector<8x1500xf32>
    %35 = arith.addf %29, %34 : vector<8x1500xf32>
    %36 = vector.extract_strided_slice %0 {offsets = [6, 0], sizes = [1, 1500], strides = [1, 1]} : vector<8x1500xf32> to vector<1x1500xf32>
    %c6 = arith.constant 6 : index
    %c0_14 = arith.constant 0 : index
    %c0_15 = arith.constant 0 : index
    %37 = vector.load %arg2[%c6, %c0_14, %c0_15] : memref<8x8x1500xf32, #tpu.memory_space<vmem>>, vector<1x8x1500xf32>
    %38 = vector.shape_cast %37 : vector<1x8x1500xf32> to vector<8x1500xf32>
    %39 = vector.broadcast %36 : vector<1x1500xf32> to vector<8x1500xf32>
    %40 = arith.mulf %39, %38 : vector<8x1500xf32>
    %41 = arith.addf %35, %40 : vector<8x1500xf32>
    %42 = vector.extract_strided_slice %0 {offsets = [7, 0], sizes = [1, 1500], strides = [1, 1]} : vector<8x1500xf32> to vector<1x1500xf32>
    %c7 = arith.constant 7 : index
    %c0_16 = arith.constant 0 : index
    %c0_17 = arith.constant 0 : index
    %43 = vector.load %arg2[%c7, %c0_16, %c0_17] : memref<8x8x1500xf32, #tpu.memory_space<vmem>>, vector<1x8x1500xf32>
    %44 = vector.shape_cast %43 : vector<1x8x1500xf32> to vector<8x1500xf32>
    %45 = vector.broadcast %42 : vector<1x1500xf32> to vector<8x1500xf32>
    %46 = arith.mulf %45, %44 : vector<8x1500xf32>
    %47 = arith.addf %41, %46 : vector<8x1500xf32>
    %48 = math.tanh %47 : vector<8x1500xf32>
    %c0_18 = arith.constant 0 : index
    %c0_19 = arith.constant 0 : index
    %49 = vector.load %arg3[%c0_18, %c0_19] : memref<8x1500xf32, #tpu.memory_space<vmem>>, vector<8x1500xf32>
    tpu.vector_store %arg3[%c0_18, %c0_19], %48 {strides = array<i32>} : memref<8x1500xf32, #tpu.memory_space<vmem>>, vector<8x1500xf32>,
    return
  }
  func.func @transform_0(%arg0: i32) -> (i32, i32) {
    %c0_i32 = arith.constant 0 : i32
    %c0_i32_0 = arith.constant 0 : i32
    return %c0_i32, %arg0 : i32, i32
  }
  func.func @transform_1(%arg0: i32) -> (i32, i32, i32) {
    %c0_i32 = arith.constant 0 : i32
    %c0_i32_0 = arith.constant 0 : i32
    %c0_i32_1 = arith.constant 0 : i32
    return %c0_i32, %c0_i32_0, %arg0 : i32, i32, i32
  }
  func.func @transform_2(%arg0: i32) -> (i32, i32) {
    %c0_i32 = arith.constant 0 : i32
    %c0_i32_0 = arith.constant 0 : i32
    return %c0_i32, %arg0 : i32, i32
  }
}

</mosaic_0001>

<bundles_post_ra>
// kernel: tpu_custom_call.1
= control target key start
LH: loop header
LB: loop body
LE: loop exit
PB: predicated region body
PF: predicated region fallthrough
CT: control target
= control target key end

     0   :  { %7 = vsyncpa [#allocation3], 0  ;;  %s1134_s0 = inlined_call_operand.hbm [shape: f32[8,1500], index: 0, kind: input, shape index: {}]   ;;  %s1135_s1 = inlined_call_operand.hbm [shape: f32[8,8,1500], index: 1, kind: input, shape index: {}]   ;;  %s1136_s2 = inlined_call_operand.hbm [shape: f32[8,1500], index: 2, kind: output, shape index: {}]  }
   0x1   :  { %8 = vsyncpa [#allocation6], 0 }
   0x2   :  { %9 = vsyncpa [#allocation4], 0  ;;  %s859_s9 = smov [#allocation2]   ;;  %s860_s11 = smov [#allocation5]  }
   0x3   :  { %s16_s10 = sshll.u32 %s859_s9, 4  ;;  %s25_s12 = sshll.u32 %s860_s11, 4  ;;  %s17_s10 = int_to_ptr.vmem [resolvable:$true] %s16_s10  ;;  %s879_s12 = int_to_ptr.vmem [resolvable:$true] %s25_s12 }
   0x4   :  { %s787_s15 = scalar_lea.hbm %s1134_s0, 1536 }
   0x5   :  { %p788_p0 = scmp.ne.s32.totalorder %s1134_s0, %s787_s15  ;;  %p791_p1 = scmp.lt.u32.totalorder %s787_s15, %s1134_s0 }
   0x7   :  { %p793_p2 = pnand %p791_p1, %p788_p0 }
   0x9   :  { %796 = shalt.err (!%p793_p2)
}
   0xa   :  { %s797_s20 = scalar_lea.vmem %s17_s10, 1536  ;;  %p802_p4 = scmp.lt.s32.totalorder %s17_s10, %s17_s10 }
   0xb   :  { %p798_p3 = scmp.ne.s32.totalorder %s17_s10, %s797_s20  ;;  %p803_p5 = scmp.lt.s32.totalorder %s797_s20, %s797_s20 }
   0xd   :  { %p804_p6 = por %p803_p5, %p802_p4 }
   0xf   :  { %p805_p7 = pnand %p804_p6, %p798_p3 }
  0x11   :  { %808 = shalt.err (!%p805_p7)
}
  0x12   :  { %19 = dma.hbm_to_vmem [thread:$0]  %s1134_s0, 1536, %s17_s10, [#allocation3]  }
  0x13   :  { %s809_s25 = scalar_lea.hbm %s1135_s1, 12288 }
  0x14   :  { %p810_p8 = scmp.ne.s32.totalorder %s1135_s1, %s809_s25  ;;  %p813_p9 = scmp.lt.u32.totalorder %s809_s25, %s1135_s1 }
  0x16   :  { %p815_p10 = pnand %p813_p9, %p810_p8 }
  0x18   :  { %818 = shalt.err (!%p815_p10)
}
  0x19   :  { %s819_s30 = scalar_lea.vmem %s879_s12, 12288  ;;  %p824_p12 = scmp.lt.s32.totalorder %s879_s12, %s879_s12 }
  0x1a   :  { %p820_p11 = scmp.ne.s32.totalorder %s879_s12, %s819_s30  ;;  %p825_p13 = scmp.lt.s32.totalorder %s819_s30, %s819_s30 }
  0x1c   :  { %p826_p0 = por %p825_p13, %p824_p12 }
  0x1e   :  { %p827_p1 = pnand %p826_p0, %p820_p11 }
  0x20   :  { %830 = shalt.err (!%p827_p1)
}
  0x21   :  { %s861_s0 = smov 1536   ;;  %s862_s3 = smov 96  }
  0x22   :  { %31 = dma.hbm_to_vmem [thread:$0]  %s1135_s1, 12288, %s879_s12, [#allocation6], %s861_s0, %s861_s0, %s862_s3  }
  0x23   :  { %853 = dma.done.wait [#allocation3], 1536  }
  0x24   :  { %854 = vsyncadd [#allocation3], 4294965760 }
  0x25   :  { %855 = dma.done.wait [#allocation6], 12288  }
  0x26   :  { %856 = vsyncadd [#allocation6], 4294955008  ;;  %v62_v0 = vlaneseq  ;;  %v38_v9 = vld [vmem:[#allocation2] sm:$0xff]  ;;  %v39_v28 = vld [vmem:[#allocation2 + $0x8] sm:$0xff]  ;;  %s863_s1 = smov [#allocation7]   ;;  %vm740_vm0 = vcmask 752640  }
  0x27   :  { %v50_v10 = vld [vmem:[#allocation5] sm:$0xff]  ;;  %v51_v33 = vld [vmem:[#allocation5 + $0x8] sm:$0xff]  ;;  %v940_v47 = vld [vmem:[#allocation2 + $0x10] sm:$0xff]  ;;  %s748_s6 = sshll.u32 %s863_s1, 4  ;;  %s749_s6 = int_to_ptr.vmem [resolvable:$true] %s748_s6 }
  0x28   :  { %v63_v1 = vshrl.u32 %v62_v0, 7  ;;  %v123_v11 = vld [vmem:[#allocation5 + $0x60] sm:$0xff]  ;;  %v124_v34 = vld [vmem:[#allocation5 + $0x68] sm:$0xff]  ;;  %v52_v58 = vld [vmem:[#allocation5 + $0x10] sm:$0xff]  ;;  %s831_s7 = scalar_lea.vmem %s749_s6, 1536  ;;  %p836_p3 = scmp.lt.s32.totalorder %s749_s6, %s749_s6 }
  0x29   :  { %v208_v15 = vld [vmem:[#allocation5 + $0xc0] sm:$0xff]  ;;  %v209_v35 = vld [vmem:[#allocation5 + $0xc8] sm:$0xff]  ;;  %v125_v0 = vld [vmem:[#allocation5 + $0x70] sm:$0xff]  ;;  %p832_p2 = scmp.ne.s32.totalorder %s749_s6, %s831_s7  ;;  %p837_p4 = scmp.lt.s32.totalorder %s831_s7, %s831_s7 }
  0x2a   :  { %v910_v2 = vsub.s32 0, %v63_v1  ;;  %v912_v3 = vsub.s32 1, %v63_v1  ;;  %v914_v4 = vsub.s32 2, %v63_v1  ;;  %v916_v5 = vsub.s32 3, %v63_v1  ;;  %v293_v17 = vld [vmem:[#allocation5 + $0x120] sm:$0xff]  ;;  %v294_v41 = vld [vmem:[#allocation5 + $0x128] sm:$0xff] }
  0x2b   :  { %v918_v6 = vsub.s32 4, %v63_v1  ;;  %v920_v7 = vsub.s32 5, %v63_v1  ;;  %v922_v8 = vsub.s32 6, %v63_v1  ;;  %v924_v12 = vsub.s32 7, %v63_v1  ;;  %v378_v19 = vld [vmem:[#allocation5 + $0x180] sm:$0xff]  ;;  %v379_v42 = vld [vmem:[#allocation5 + $0x188] sm:$0xff]  ;;  %p838_p5 = por %p837_p4, %p836_p3 }
  0x2c   :  { %v65_v13 = vrot.slane %v38_v9, %v910_v2  ;;  %v138_v14 = vrot.slane %v38_v9, %v912_v3  ;;  %v223_v16 = vrot.slane %v38_v9, %v914_v4  ;;  %v308_v18 = vrot.slane %v38_v9, %v916_v5  ;;  %v463_v21 = vld [vmem:[#allocation5 + $0x1e0] sm:$0xff]  ;;  %v464_v55 = vld [vmem:[#allocation5 + $0x1e8] sm:$0xff]  ;;  %v210_v1 = vld [vmem:[#allocation5 + $0xd0] sm:$0xff] }
  0x2d   :  { %v393_v20 = vrot.slane %v38_v9, %v918_v6  ;;  %v478_v22 = vrot.slane %v38_v9, %v920_v7  ;;  %v563_v23 = vrot.slane %v38_v9, %v922_v8  ;;  %v548_v27 = vld [vmem:[#allocation5 + $0x240] sm:$0xff]  ;;  %v648_v32 = vrot.slane %v38_v9, %v924_v12  ;;  %v549_v56 = vld [vmem:[#allocation5 + $0x248] sm:$0xff]  ;;  %p839_p6 = pnand %p838_p5, %p832_p2 }
  0x2e   :  { %v110_v24 = vmul.f32 %v65_v13, %v50_v10  ;;  %v183_v25 = vmul.f32 %v138_v14, %v123_v11  ;;  %v268_v26 = vmul.f32 %v223_v16, %v208_v15  ;;  %v353_v29 = vmul.f32 %v308_v18, %v293_v17  ;;  %v633_v37 = vld [vmem:[#allocation5 + $0x2a0] sm:$0xff]  ;;  %v634_v61 = vld [vmem:[#allocation5 + $0x2a8] sm:$0xff]  ;;  %v295_v11 = vld [vmem:[#allocation5 + $0x130] sm:$0xff] }
  0x2f   :  { %v438_v30 = vmul.f32 %v393_v20, %v378_v19  ;;  %v523_v31 = vmul.f32 %v478_v22, %v463_v21  ;;  %v69_v38 = vrot.slane %v39_v28, %v910_v2  ;;  %v142_v39 = vrot.slane %v39_v28, %v912_v3  ;;  %v380_v19 = vld [vmem:[#allocation5 + $0x190] sm:$0xff]  ;;  %v954_v20 = vld [vmem:[#allocation2 + $0x18] sm:$0xff] }
  0x30   :  { %v195_v36 = vadd.f32 %v183_v25, %v110_v24  ;;  %v227_v40 = vrot.slane %v39_v28, %v914_v4  ;;  %v608_v43 = vmul.f32 %v563_v23, %v548_v27  ;;  %v312_v44 = vrot.slane %v39_v28, %v916_v5 }
  0x31   :  { %v397_v45 = vrot.slane %v39_v28, %v918_v6  ;;  %v482_v46 = vrot.slane %v39_v28, %v920_v7  ;;  %v111_v49 = vmul.f32 %v69_v38, %v51_v33  ;;  %v184_v50 = vmul.f32 %v142_v39, %v124_v34  ;;  %v126_v33 = vld [vmem:[#allocation5 + $0x78] sm:$0xff] }
  0x32   :  { %v280_v48 = vadd.f32 %v268_v26, %v195_v36  ;;  %v269_v51 = vmul.f32 %v227_v40, %v209_v35  ;;  %v693_v52 = vmul.f32 %v648_v32, %v633_v37  ;;  %v354_v53 = vmul.f32 %v312_v44, %v294_v41  ;;  %v53_v32 = vld [vmem:[#allocation5 + $0x18] sm:$0xff] }
  0x33   :  { %v439_v54 = vmul.f32 %v397_v45, %v379_v42  ;;  %v567_v57 = vrot.slane %v39_v28, %v922_v8  ;;  %v196_v60 = vadd.f32 %v184_v50, %v111_v49  ;;  %v652_v62 = vrot.slane %v39_v28, %v924_v12  ;;  %v465_v28 = vld [vmem:[#allocation5 + $0x1f0] sm:$0xff]  ;;  %v211_v45 = vld [vmem:[#allocation5 + $0xd8] sm:$0xff] }
  0x34   :  { %v365_v59 = vadd.f32 %v353_v29, %v280_v48  ;;  %v73_v63 = vrot.slane %v940_v47, %v910_v2  ;;  %v146_v9 = vrot.slane %v940_v47, %v912_v3  ;;  %v231_v10 = vrot.slane %v940_v47, %v914_v4  ;;  %v550_v50 = vld [vmem:[#allocation5 + $0x250] sm:$0xff] }
  0x35   :  { %v316_v13 = vrot.slane %v940_v47, %v916_v5  ;;  %v401_v14 = vrot.slane %v940_v47, %v918_v6  ;;  %v281_v16 = vadd.f32 %v269_v51, %v196_v60  ;;  %v524_v17 = vmul.f32 %v482_v46, %v464_v55  ;;  %v296_v46 = vld [vmem:[#allocation5 + $0x138] sm:$0xff]  ;;  %v635_v51 = vld [vmem:[#allocation5 + $0x2b0] sm:$0xff] }
  0x36   :  { %v450_v15 = vadd.f32 %v438_v30, %v365_v59  ;;  %v112_v18 = vmul.f32 %v73_v63, %v52_v58  ;;  %v609_v21 = vmul.f32 %v567_v57, %v549_v56  ;;  %v694_v22 = vmul.f32 %v652_v62, %v634_v61  ;;  %v974_v58 = vld [vmem:[#allocation2 + $0x20] sm:$0xff]  ;;  %v466_v61 = vld [vmem:[#allocation5 + $0x1f8] sm:$0xff] }
  0x37   :  { %v185_v23 = vmul.f32 %v146_v9, %v125_v0  ;;  %v270_v24 = vmul.f32 %v231_v10, %v210_v1  ;;  %v366_v26 = vadd.f32 %v354_v53, %v281_v16  ;;  %v355_v27 = vmul.f32 %v316_v13, %v295_v11  ;;  %v54_v9 = vld [vmem:[#allocation5 + $0x20] sm:$0xff] }
  0x38   :  { %v535_v25 = vadd.f32 %v523_v31, %v450_v15  ;;  %v486_v29 = vrot.slane %v940_v47, %v920_v7  ;;  %v440_v34 = vmul.f32 %v401_v14, %v380_v19  ;;  %v77_v35 = vrot.slane %v954_v20, %v910_v2  ;;  %v127_v15 = vld [vmem:[#allocation5 + $0x80] sm:$0xff]  ;;  %v551_v19 = vld [vmem:[#allocation5 + $0x258] sm:$0xff] }
  0x39   :  { %v197_v30 = vadd.f32 %v185_v23, %v112_v18  ;;  %v150_v36 = vrot.slane %v954_v20, %v912_v3  ;;  %v451_v38 = vadd.f32 %v439_v54, %v366_v26  ;;  %v571_v31 = vrot.slane %v940_v47, %v922_v8  ;;  %v381_v54 = vld [vmem:[#allocation5 + $0x198] sm:$0xff]  ;;  %v212_v16 = vld [vmem:[#allocation5 + $0xe0] sm:$0xff] }
  0x3a   :  { %v620_v37 = vadd.f32 %v608_v43, %v535_v25  ;;  %v656_v39 = vrot.slane %v940_v47, %v924_v12  ;;  %v525_v41 = vmul.f32 %v486_v29, %v465_v28  ;;  %v113_v42 = vmul.f32 %v77_v35, %v53_v32  ;;  %v297_v26 = vld [vmem:[#allocation5 + $0x140] sm:$0xff]  ;;  %v636_v28 = vld [vmem:[#allocation5 + $0x2b8] sm:$0xff] }
  0x3b   :  { %v282_v40 = vadd.f32 %v270_v24, %v197_v30  ;;  %v186_v44 = vmul.f32 %v150_v36, %v126_v33  ;;  %v536_v49 = vadd.f32 %v524_v17, %v451_v38  ;;  %v235_v43 = vrot.slane %v954_v20, %v914_v4  ;;  %v382_v30 = vld [vmem:[#allocation5 + $0x1a0] sm:$0xff] }
  0x3c   :  { %v705_v48 = vadd.f32 %v693_v52, %v620_v37  ;;  %v320_v53 = vrot.slane %v954_v20, %v916_v5  ;;  %v405_v47 = vrot.slane %v954_v20, %v918_v6  ;;  %v490_v57 = vrot.slane %v954_v20, %v920_v7  ;;  %v467_v37 = vld [vmem:[#allocation5 + $0x200] sm:$0xff] }
  0x3d   :  { %v367_v55 = vadd.f32 %v355_v27, %v282_v40  ;;  %v198_v56 = vadd.f32 %v186_v44, %v113_v42  ;;  %v621_v52 = vadd.f32 %v609_v21, %v536_v49  ;;  %v271_v59 = vmul.f32 %v235_v43, %v211_v45  ;;  %v55_v49 = vld [vmem:[#allocation5 + $0x28] sm:$0xff] }
  0x3e   :  { %763 = vtanh.f32 %v705_v48  ;;  %v356_v60 = vmul.f32 %v320_v53, %v296_v46  ;;  %v610_v63 = vmul.f32 %v571_v31, %v550_v50  ;;  %v695_v0 = vmul.f32 %v656_v39, %v635_v51  ;;  %v552_v46 = vld [vmem:[#allocation5 + $0x260] sm:$0xff]  ;;  %v128_v53 = vld [vmem:[#allocation5 + $0x88] sm:$0xff] }
  0x3f   :  { %v452_v62 = vadd.f32 %v440_v34, %v367_v55  ;;  %v441_v1 = vmul.f32 %v405_v47, %v381_v54  ;;  %v706_v10 = vadd.f32 %v694_v22, %v621_v52  ;;  %v283_v11 = vadd.f32 %v271_v59, %v198_v56  ;;  %v213_v54 = vld [vmem:[#allocation5 + $0xe8] sm:$0xff]  ;;  %v637_v47 = vld [vmem:[#allocation5 + $0x2c0] sm:$0xff] }
  0x40   :  { %v575_v13 = vrot.slane %v954_v20, %v922_v8  ;;  %v81_v14 = vrot.slane %v974_v58, %v910_v2  ;;  %v526_v18 = vmul.f32 %v490_v57, %v466_v61  ;;  %v154_v21 = vrot.slane %v974_v58, %v912_v3  ;;  %v298_v59 = vld [vmem:[#allocation5 + $0x148] sm:$0xff] }
  0x41   :  { %v537_v17 = vadd.f32 %v525_v41, %v452_v62  ;;  %v239_v23 = vrot.slane %v974_v58, %v914_v4  ;;  %765 = vtanh.f32 %v706_v10  ;;  %v368_v22 = vadd.f32 %v356_v60, %v283_v11  ;;  %v383_v11 = vld [vmem:[#allocation5 + $0x1a8] sm:$0xff] }
  0x42   :  { %v660_v24 = vrot.slane %v954_v20, %v924_v12  ;;  %v114_v25 = vmul.f32 %v81_v14, %v54_v9  ;;  %v187_v29 = vmul.f32 %v154_v21, %v127_v15  ;;  %v324_v33 = vrot.slane %v974_v58, %v916_v5  ;;  %v992_v20 = vld [vmem:[#allocation2 + $0x28] sm:$0xff] }
  0x43   :  { %v622_v27 = vadd.f32 %v610_v63, %v537_v17  ;;  %v272_v32 = vmul.f32 %v239_v23, %v212_v16  ;;  %v453_v34 = vadd.f32 %v441_v1, %v368_v22  ;;  %v611_v35 = vmul.f32 %v575_v13, %v551_v19  ;;  %v468_v17 = vld [vmem:[#allocation5 + $0x208] sm:$0xff]  ;;  %v56_v19 = vld [vmem:[#allocation5 + $0x30] sm:$0xff] }
  0x44   :  { %v409_v36 = vrot.slane %v974_v58, %v918_v6  ;;  %v494_v38 = vrot.slane %v974_v58, %v920_v7  ;;  %v199_v39 = vadd.f32 %v187_v29, %v114_v25  ;;  %v357_v40 = vmul.f32 %v324_v33, %v297_v26  ;;  %v129_v25 = vld [vmem:[#allocation5 + $0x90] sm:$0xff]  ;;  %v553_v29 = vld [vmem:[#allocation5 + $0x268] sm:$0xff] }
  0x45   :  { %v707_v31 = vadd.f32 %v695_v0, %v622_v27  ;;  %v579_v41 = vrot.slane %v974_v58, %v922_v8  ;;  %v538_v42 = vadd.f32 %v526_v18, %v453_v34  ;;  %v696_v44 = vmul.f32 %v660_v24, %v636_v28  ;;  %v1008_v0 = vld [vmem:[#allocation2 + $0x30] sm:$0xff] }
  0x46   :  { %v442_v45 = vmul.f32 %v409_v36, %v382_v30  ;;  %v664_v48 = vrot.slane %v974_v58, %v924_v12  ;;  %v284_v50 = vadd.f32 %v272_v32, %v199_v39  ;;  %v527_v51 = vmul.f32 %v494_v38, %v467_v37  ;;  %v214_v26 = vld [vmem:[#allocation5 + $0xf0] sm:$0xff]  ;;  %v638_v32 = vld [vmem:[#allocation5 + $0x2c8] sm:$0xff] }
  0x47   :  { %767 = vtanh.f32 %v707_v31  ;;  %v85_v43 = vrot.slane %v992_v20, %v910_v2  ;;  %v623_v56 = vadd.f32 %v611_v35, %v538_v42  ;;  %v158_v57 = vrot.slane %v992_v20, %v912_v3  ;;  %v299_v37 = vld [vmem:[#allocation5 + $0x150] sm:$0xff]  ;;  %v1026_v42 = vld [vmem:[#allocation2 + $0x38] sm:$0xff] }
  0x48   :  { %v764_v55 = vpop.eup %763  ;;  %v243_v52 = vrot.slane %v992_v20, %v914_v4  ;;  %v328_v58 = vrot.slane %v992_v20, %v916_v5  ;;  %v369_v60 = vadd.f32 %v357_v40, %v284_v50  ;;  %v612_v61 = vmul.f32 %v579_v41, %v552_v46  ;;  %v384_v40 = vld [vmem:[#allocation5 + $0x1b0] sm:$0xff] }
  0x49   :  { %729 = vst [vmem:[#allocation7] sm:$0xff] %v764_v55  ;;  %v115_v62 = vmul.f32 %v85_v43, %v55_v49  ;;  %v413_v63 = vrot.slane %v992_v20, %v918_v6  ;;  %v708_v1 = vadd.f32 %v696_v44, %v623_v56  ;;  %v188_v9 = vmul.f32 %v158_v57, %v128_v53  ;;  %v57_v55 = vld [vmem:[#allocation5 + $0x38] sm:$0xff] }
  0x4a   :  { %v273_v10 = vmul.f32 %v243_v52, %v213_v54  ;;  %v498_v13 = vrot.slane %v992_v20, %v920_v7  ;;  %v454_v14 = vadd.f32 %v442_v45, %v369_v60  ;;  %v697_v15 = vmul.f32 %v664_v48, %v637_v47  ;;  %v469_v48 = vld [vmem:[#allocation5 + $0x210] sm:$0xff] }
  0x4b   :  { %v358_v16 = vmul.f32 %v328_v58, %v298_v59  ;;  %v583_v18 = vrot.slane %v992_v20, %v922_v8  ;;  %v766_v21 = vpop.eup %765  ;;  %769 = vtanh.f32 %v708_v1  ;;  %v200_v23 = vadd.f32 %v188_v9, %v115_v62  ;;  %v130_v59 = vld [vmem:[#allocation5 + $0x98] sm:$0xff]  ;;  %v639_v62 = vld [vmem:[#allocation5 + $0x2d0] sm:$0xff] }
  0x4c   :  { %v668_v22 = vrot.slane %v992_v20, %v924_v12  ;;  %v89_v24 = vrot.slane %v1008_v0, %v910_v2  ;;  %730 = vst [vmem:[#allocation7 + $0x8] sm:$0xff] %v766_v21  ;;  %v539_v27 = vadd.f32 %v527_v51, %v454_v14  ;;  %v443_v28 = vmul.f32 %v413_v63, %v383_v11  ;;  %v215_v1 = vld [vmem:[#allocation5 + $0xf8] sm:$0xff]  ;;  %v1046_v21 = vld [vmem:[#allocation2 + $0x40] sm:$0xff] }
  0x4d   :  { %v162_v33 = vrot.slane %v1008_v0, %v912_v3  ;;  %v247_v30 = vrot.slane %v1008_v0, %v914_v4  ;;  %v285_v34 = vadd.f32 %v273_v10, %v200_v23  ;;  %v528_v35 = vmul.f32 %v498_v13, %v468_v17  ;;  %v300_v13 = vld [vmem:[#allocation5 + $0x158] sm:$0xff] }
  0x4e   :  { %v116_v36 = vmul.f32 %v89_v24, %v56_v19  ;;  %v332_v38 = vrot.slane %v1008_v0, %v916_v5  ;;  %v624_v20 = vadd.f32 %v612_v61, %v539_v27  ;;  %v417_v41 = vrot.slane %v1008_v0, %v918_v6  ;;  %v554_v61 = vld [vmem:[#allocation5 + $0x270] sm:$0xff] }
  0x4f   :  { %v189_v31 = vmul.f32 %v162_v33, %v129_v25  ;;  %v274_v39 = vmul.f32 %v247_v30, %v214_v26  ;;  %v370_v44 = vadd.f32 %v358_v16, %v285_v34  ;;  %v613_v45 = vmul.f32 %v583_v18, %v553_v29  ;;  %v385_v16 = vld [vmem:[#allocation5 + $0x1b8] sm:$0xff]  ;;  %v58_v33 = vld [vmem:[#allocation5 + $0x40] sm:$0xff] }
  0x50   :  { %v698_v46 = vmul.f32 %v668_v22, %v638_v32  ;;  %v502_v49 = vrot.slane %v1008_v0, %v920_v7  ;;  %v709_v51 = vadd.f32 %v697_v15, %v624_v20  ;;  %v359_v53 = vmul.f32 %v332_v38, %v299_v37  ;;  %v470_v18 = vld [vmem:[#allocation5 + $0x218] sm:$0xff]  ;;  %v131_v37 = vld [vmem:[#allocation5 + $0xa0] sm:$0xff] }
  0x51   :  { %v768_v50 = vpop.eup %767  ;;  %v201_v43 = vadd.f32 %v189_v31, %v116_v36  ;;  %v587_v54 = vrot.slane %v1008_v0, %v922_v8  ;;  %v455_v56 = vadd.f32 %v443_v28, %v370_v44  ;;  %v444_v47 = vmul.f32 %v417_v41, %v384_v40  ;;  %v216_v38 = vld [vmem:[#allocation5 + $0x100] sm:$0xff] }
  0x52   :  { %731 = vst [vmem:[#allocation7 + $0x10] sm:$0xff] %v768_v50  ;;  %v672_v57 = vrot.slane %v1008_v0, %v924_v12  ;;  %v93_v52 = vrot.slane %v1026_v42, %v910_v2  ;;  %771 = vtanh.f32 %v709_v51  ;;  %v529_v60 = vmul.f32 %v502_v49, %v469_v48  ;;  %v301_v44 = vld [vmem:[#allocation5 + $0x160] sm:$0xff]  ;;  %v640_v51 = vld [vmem:[#allocation5 + $0x2d8] sm:$0xff] }
  0x53   :  { %v286_v58 = vadd.f32 %v274_v39, %v201_v43  ;;  %v166_v63 = vrot.slane %v1026_v42, %v912_v3  ;;  %v540_v9 = vadd.f32 %v528_v35, %v455_v56  ;;  %v251_v11 = vrot.slane %v1026_v42, %v914_v4  ;;  %v555_v39 = vld [vmem:[#allocation5 + $0x278] sm:$0xff] }
  0x54   :  { %v117_v10 = vmul.f32 %v93_v52, %v57_v55  ;;  %v336_v0 = vrot.slane %v1026_v42, %v916_v5  ;;  %v421_v17 = vrot.slane %v1026_v42, %v918_v6  ;;  %v506_v19 = vrot.slane %v1026_v42, %v920_v7 }
  0x55   :  { %v371_v14 = vadd.f32 %v359_v53, %v286_v58  ;;  %v190_v15 = vmul.f32 %v166_v63, %v130_v59  ;;  %v770_v23 = vpop.eup %769  ;;  %v625_v22 = vadd.f32 %v613_v45, %v540_v9  ;;  %v614_v24 = vmul.f32 %v587_v54, %v554_v61  ;;  %v1060_v54 = vld [vmem:[#allocation2 + $0x48] sm:$0xff]  ;;  %v556_v9 = vld [vmem:[#allocation5 + $0x280] sm:$0xff] }
  0x56   :  { %v699_v25 = vmul.f32 %v672_v57, %v639_v62  ;;  %v275_v26 = vmul.f32 %v251_v11, %v215_v1  ;;  %732 = vst [vmem:[#allocation7 + $0x18] sm:$0xff] %v770_v23  ;;  %v360_v29 = vmul.f32 %v336_v0, %v300_v13  ;;  %v591_v32 = vrot.slane %v1026_v42, %v922_v8  ;;  %v59_v62 = vld [vmem:[#allocation5 + $0x48] sm:$0xff]  ;;  %v471_v1 = vld [vmem:[#allocation5 + $0x220] sm:$0xff] }
  0x57   :  { %v456_v27 = vadd.f32 %v444_v47, %v371_v14  ;;  %v202_v28 = vadd.f32 %v190_v15, %v117_v10  ;;  %v710_v30 = vadd.f32 %v698_v46, %v625_v22  ;;  %v445_v34 = vmul.f32 %v421_v17, %v385_v16  ;;  %v386_v47 = vld [vmem:[#allocation5 + $0x1c0] sm:$0xff]  ;;  %v132_v16 = vld [vmem:[#allocation5 + $0xa8] sm:$0xff] }
  0x58   :  { %v530_v35 = vmul.f32 %v506_v19, %v470_v18  ;;  %v97_v36 = vrot.slane %v1046_v21, %v910_v2  ;;  %v170_v40 = vrot.slane %v1046_v21, %v912_v3  ;;  %v255_v41 = vrot.slane %v1046_v21, %v914_v4  ;;  %v641_v15 = vld [vmem:[#allocation5 + $0x2e0] sm:$0xff]  ;;  %v217_v17 = vld [vmem:[#allocation5 + $0x108] sm:$0xff] }
  0x59   :  { %v541_v20 = vadd.f32 %v529_v60, %v456_v27  ;;  %v287_v31 = vadd.f32 %v275_v26, %v202_v28  ;;  %773 = vtanh.f32 %v710_v30  ;;  %v676_v45 = vrot.slane %v1026_v42, %v924_v12  ;;  %v302_v22 = vld [vmem:[#allocation5 + $0x168] sm:$0xff]  ;;  %v1078_v28 = vld [vmem:[#allocation2 + $0x50] sm:$0xff] }
  0x5a   :  { %v118_v46 = vmul.f32 %v97_v36, %v58_v33  ;;  %v340_v48 = vrot.slane %v1046_v21, %v916_v5  ;;  %v191_v43 = vmul.f32 %v170_v40, %v131_v37  ;;  %v276_v53 = vmul.f32 %v255_v41, %v216_v38  ;;  %v387_v37 = vld [vmem:[#allocation5 + $0x1c8] sm:$0xff] }
  0x5b   :  { %v626_v49 = vadd.f32 %v614_v24, %v541_v20  ;;  %v372_v50 = vadd.f32 %v360_v29, %v287_v31  ;;  %v615_v55 = vmul.f32 %v591_v32, %v555_v39  ;;  %v425_v57 = vrot.slane %v1046_v21, %v918_v6  ;;  %v60_v20 = vld [vmem:[#allocation5 + $0x50] sm:$0xff] }
  0x5c   :  { %v361_v56 = vmul.f32 %v340_v48, %v301_v44  ;;  %v510_v42 = vrot.slane %v1046_v21, %v920_v7  ;;  %v772_v52 = vpop.eup %771  ;;  %v203_v60 = vadd.f32 %v191_v43, %v118_v46  ;;  %v595_v61 = vrot.slane %v1046_v21, %v922_v8  ;;  %v218_v46 = vld [vmem:[#allocation5 + $0x110] sm:$0xff] }
  0x5d   :  { %v711_v59 = vadd.f32 %v699_v25, %v626_v49  ;;  %v457_v58 = vadd.f32 %v445_v34, %v372_v50  ;;  %733 = vst [vmem:[#allocation7 + $0x20] sm:$0xff] %v772_v52  ;;  %v700_v63 = vmul.f32 %v676_v45, %v640_v51  ;;  %v680_v10 = vrot.slane %v1046_v21, %v924_v12  ;;  %v133_v45 = vld [vmem:[#allocation5 + $0xb0] sm:$0xff]  ;;  %v472_v49 = vld [vmem:[#allocation5 + $0x228] sm:$0xff] }
  0x5e   :  { %v101_v11 = vrot.slane %v1060_v54, %v910_v2  ;;  %v288_v0 = vadd.f32 %v276_v53, %v203_v60  ;;  %v446_v14 = vmul.f32 %v425_v57, %v386_v47  ;;  %v174_v19 = vrot.slane %v1060_v54, %v912_v3  ;;  %v557_v50 = vld [vmem:[#allocation5 + $0x288] sm:$0xff]  ;;  %v303_v47 = vld [vmem:[#allocation5 + $0x170] sm:$0xff] }
  0x5f   :  { %775 = vtanh.f32 %v711_v59  ;;  %v542_v13 = vadd.f32 %v530_v35, %v457_v58  ;;  %v259_v23 = vrot.slane %v1060_v54, %v914_v4  ;;  %v344_v21 = vrot.slane %v1060_v54, %v916_v5  ;;  %v642_v51 = vld [vmem:[#allocation5 + $0x2e8] sm:$0xff]  ;;  %v388_v58 = vld [vmem:[#allocation5 + $0x1d0] sm:$0xff] }
  0x60   :  { %v119_v18 = vmul.f32 %v101_v11, %v59_v62  ;;  %v373_v25 = vadd.f32 %v361_v56, %v288_v0  ;;  %v531_v26 = vmul.f32 %v510_v42, %v471_v1  ;;  %v616_v27 = vmul.f32 %v595_v61, %v556_v9  ;;  %v1098_v61 = vld [vmem:[#allocation2 + $0x58] sm:$0xff] }
  0x61   :  { %v627_v24 = vadd.f32 %v615_v55, %v542_v13  ;;  %v701_v29 = vmul.f32 %v680_v10, %v641_v15  ;;  %v192_v32 = vmul.f32 %v174_v19, %v132_v16  ;;  %v277_v33 = vmul.f32 %v259_v23, %v217_v17  ;;  %v61_v15 = vld [vmem:[#allocation5 + $0x58] sm:$0xff] }
  0x62   :  { %v429_v30 = vrot.slane %v1060_v54, %v918_v6  ;;  %v458_v35 = vadd.f32 %v446_v14, %v373_v25  ;;  %v362_v36 = vmul.f32 %v344_v21, %v302_v22  ;;  %v514_v38 = vrot.slane %v1060_v54, %v920_v7  ;;  %v134_v22 = vld [vmem:[#allocation5 + $0xb8] sm:$0xff] }
  0x63   :  { %v712_v34 = vadd.f32 %v700_v63, %v627_v24  ;;  %v774_v31 = vpop.eup %773  ;;  %v204_v39 = vadd.f32 %v192_v32, %v119_v18  ;;  %v599_v40 = vrot.slane %v1060_v54, %v922_v8  ;;  %v684_v41 = vrot.slane %v1060_v54, %v924_v12  ;;  %v473_v18 = vld [vmem:[#allocation5 + $0x230] sm:$0xff] }
  0x64   :  { %v105_v44 = vrot.slane %v1078_v28, %v910_v2  ;;  %734 = vst [vmem:[#allocation7 + $0x28] sm:$0xff] %v774_v31  ;;  %v543_v48 = vadd.f32 %v531_v26, %v458_v35  ;;  %v178_v43 = vrot.slane %v1078_v28, %v912_v3  ;;  %v263_v53 = vrot.slane %v1078_v28, %v914_v4  ;;  %v558_v24 = vld [vmem:[#allocation5 + $0x290] sm:$0xff]  ;;  %v389_v31 = vld [vmem:[#allocation5 + $0x1d8] sm:$0xff] }
  0x65   :  { %777 = vtanh.f32 %v712_v34  ;;  %v289_v55 = vadd.f32 %v277_v33, %v204_v39  ;;  %v447_v56 = vmul.f32 %v429_v30, %v387_v37  ;;  %v348_v57 = vrot.slane %v1078_v28, %v916_v5  ;;  %v304_v30 = vld [vmem:[#allocation5 + $0x178] sm:$0xff] }
  0x66   :  { %v120_v54 = vmul.f32 %v105_v44, %v60_v20  ;;  %v628_v42 = vadd.f32 %v616_v27, %v543_v48  ;;  %v193_v52 = vmul.f32 %v178_v43, %v133_v45  ;;  %v278_v59 = vmul.f32 %v263_v53, %v218_v46  ;;  %v219_v27 = vld [vmem:[#allocation5 + $0x118] sm:$0xff] }
  0x67   :  { %v433_v60 = vrot.slane %v1078_v28, %v918_v6  ;;  %v374_v62 = vadd.f32 %v362_v36, %v289_v55  ;;  %v532_v63 = vmul.f32 %v514_v38, %v472_v49  ;;  %v617_v1 = vmul.f32 %v599_v40, %v557_v50  ;;  %v643_v36 = vld [vmem:[#allocation5 + $0x2f0] sm:$0xff]  ;;  %v474_v46 = vld [vmem:[#allocation5 + $0x238] sm:$0xff] }
  0x68   :  { %v702_v9 = vmul.f32 %v684_v41, %v642_v51  ;;  %v713_v11 = vadd.f32 %v701_v29, %v628_v42  ;;  %v205_v13 = vadd.f32 %v193_v52, %v120_v54  ;;  %v363_v0 = vmul.f32 %v348_v57, %v303_v47  ;;  %v559_v51 = vld [vmem:[#allocation5 + $0x298] sm:$0xff] }
  0x69   :  { %v776_v10 = vpop.eup %775  ;;  %v518_v14 = vrot.slane %v1078_v28, %v920_v7  ;;  %v459_v16 = vadd.f32 %v447_v56, %v374_v62  ;;  %v448_v17 = vmul.f32 %v433_v60, %v388_v58  ;;  %v603_v19 = vrot.slane %v1078_v28, %v922_v8  ;;  %v644_v54 = vld [vmem:[#allocation5 + $0x2f8] sm:$0xff] }
  0x6a   :  { %735 = vst [vmem:[#allocation7 + $0x30] sm:$0xff] %v776_v10  ;;  %v109_v23 = vrot.slane %v1098_v61, %v910_v2  ;;  %779 = vtanh.f32 %v713_v11  ;;  %v290_v21 = vadd.f32 %v278_v59, %v205_v13  ;;  %v688_v25 = vrot.slane %v1078_v28, %v924_v12 }
  0x6b   :  { %v182_v26 = vrot.slane %v1098_v61, %v912_v3  ;;  %v544_v29 = vadd.f32 %v532_v63, %v459_v16  ;;  %v267_v33 = vrot.slane %v1098_v61, %v914_v4  ;;  %v352_v2 = vrot.slane %v1098_v61, %v916_v5 }
  0x6c   :  { %v121_v32 = vmul.f32 %v109_v23, %v61_v15  ;;  %v375_v34 = vadd.f32 %v363_v0, %v290_v21  ;;  %v533_v35 = vmul.f32 %v518_v14, %v473_v18  ;;  %v437_v28 = vrot.slane %v1098_v61, %v918_v6 }
  0x6d   :  { %v194_v37 = vmul.f32 %v182_v26, %v134_v22  ;;  %v629_v38 = vadd.f32 %v617_v1, %v544_v29  ;;  %v618_v20 = vmul.f32 %v603_v19, %v558_v24  ;;  %v279_v3 = vmul.f32 %v267_v33, %v219_v27 }
  0x6e   :  { %v460_v40 = vadd.f32 %v448_v17, %v375_v34  ;;  %v364_v44 = vmul.f32 %v352_v2, %v304_v30  ;;  %v522_v4 = vrot.slane %v1098_v61, %v920_v7  ;;  %v703_v45 = vmul.f32 %v688_v25, %v643_v36 }
  0x6f   :  { %v778_v39 = vpop.eup %777  ;;  %v206_v41 = vadd.f32 %v194_v37, %v121_v32  ;;  %v714_v5 = vadd.f32 %v702_v9, %v629_v38  ;;  %v449_v50 = vmul.f32 %v437_v28, %v389_v31  ;;  %v607_v6 = vrot.slane %v1098_v61, %v922_v8 }
  0x70   :  { %736 = vst [vmem:[#allocation7 + $0x38] sm:$0xff] %v778_v39  ;;  %v545_v48 = vadd.f32 %v533_v35, %v460_v40  ;;  %v534_v55 = vmul.f32 %v522_v4, %v474_v46  ;;  %v692_v56 = vrot.slane %v1098_v61, %v924_v12 }
  0x71   :  { %v291_v49 = vadd.f32 %v279_v3, %v206_v41  ;;  %781 = vtanh.f32 %v714_v5  ;;  %v619_v42 = vmul.f32 %v607_v6, %v559_v51 }
  0x72   :  { %v630_v43 = vadd.f32 %v618_v20, %v545_v48  ;;  %v704_v59 = vmul.f32 %v692_v56, %v644_v54 }
  0x73   :  { %v376_v53 = vadd.f32 %v364_v44, %v291_v49 }
  0x74   :  { %v780_v7 = vpop.eup %779  ;;  %v715_v47 = vadd.f32 %v703_v45, %v630_v43 }
  0x75   :  { %v461_v57 = vadd.f32 %v449_v50, %v376_v53  ;;  %737 = vst [vmem:[#allocation7 + $0x40] sm:$0xff] %v780_v7 }
  0x76   :  { %783 = vtanh.f32 %v715_v47 }
  0x77   :  { %v546_v52 = vadd.f32 %v534_v55, %v461_v57 }
  0x79   :  { %v631_v58 = vadd.f32 %v619_v42, %v546_v52 }
  0x7b   :  { %v716_v60 = vadd.f32 %v704_v59, %v631_v58  ;;  %v782_v8 = vpop.eup %781 }
  0x7c   :  { %738 = vst [vmem:[#allocation7 + $0x48] sm:$0xff] %v782_v8 }
  0x7d   :  { %785 = vtanh.f32 %v716_v60 }
  0x80   :  { %v784_v62 = vpop.eup %783 }
  0x81   :  { %739 = vst [vmem:[#allocation7 + $0x50] sm:$0xff] %v784_v62 }
  0x87   :  { %v786_v12 = vpop.eup %785 }
  0x88   :  { %741 = vst.msk [vmem:[#allocation7 + $0x58] sm:$0xff] %vm740_vm0, %v786_v12 }
  0x89   :  { %842 = shalt.err (!%p839_p6)
}
  0x8a   :  { %s843_s10 = scalar_lea.hbm %s1136_s2, 1536 }
  0x8b   :  { %p844_p7 = scmp.ne.s32.totalorder %s1136_s2, %s843_s10  ;;  %p847_p8 = scmp.lt.u32.totalorder %s843_s10, %s1136_s2 }
  0x8d   :  { %p849_p9 = pnand %p847_p8, %p844_p7 }
  0x8f   :  { %852 = shalt.err (!%p849_p9)
}
  0x90   :  { %751 = dma.vmem_to_hbm [thread:$0]  %s749_s6, 1536, %s1136_s2, [#allocation4]  }
  0x91   :  { %857 = dma.done.wait [#allocation4], 1536  }
  0x92   :  { %858 = vsyncadd [#allocation4], 4294965760 }
  0x93   :  { %755 = vsyncpa [#allocation3], 1 }
  0x94   :  { %756 = vsyncpa [#allocation6], 1 }
  0x95   :  { %757 = vsyncpa [#allocation4], 1 }

</bundles_post_ra>
